<compile_context>
chip_gen: v5e
topology: v5e:2x2
jax: 0.10.0
libtpu: 0.0.40
codegen_flags: <defaults>
</compile_context>

<pallas_src>
import functools

import jax
import jax.numpy as jnp
from jax import lax
from jax.experimental import pallas as pl
from jax.experimental.pallas import tpu as pltpu

_LANE = 128
_READ_ROW = 16   # bf16 sublane tile is 16 rows -> aligned MXU-feeding reads


def _round_up(x, m):
    return (x + m - 1) // m * m


def _down_kernel(x_ref, xh_ref, w1_ref, b1_ref, w2_ref, b2_ref, o_ref,
                 xc_ref, hc_ref, *, th_true):
    # x_ref : (1, TILE, 2*Cin_p) bf16   row t = [x[2(t0+t)], x[2(t0+t)+1]] packed on lanes
    # xh_ref: (1, 1, 4, 2*Cin_p) bf16   pooled-halo rows {t0-2, t0-1, t0+TILE, t0+TILE+1}
    # w1_ref: (3*Cin_p, Cout_p) bf16    fused taps [W_k0; W_k1; W_k2], BN folded in
    # b1_ref: (1, Cout_p) f32           conv bias + BN shift folded together
    # w2_ref: (3*Cout_p, Cout_p) bf16 ; b2_ref: (1, Cout_p) f32
    # o_ref : (1, TILE, Cout_p) f32
    # xc_ref: (SR, 3*Cin_p) bf16        im2col scratch, conv #1
    # hc_ref: (SR, 3*Cout_p) bf16       im2col scratch, conv #2
    tile = x_ref.shape[1]
    cin = x_ref.shape[2] // 2
    cout = o_ref.shape[2]
    k = pl.program_id(1)
    R = _READ_ROW

    # ---- MaxPool1d(2): elementwise max of the two lane bands ----
    xm = x_ref[0]                                          # (TILE, 2*Cin_p)
    xh = xh_ref[0, 0]                                      # (4,    2*Cin_p)
    pooled = jnp.maximum(xm[:, :cin], xm[:, cin:])         # (TILE, Cin_p)
    halo = jnp.maximum(xh[:, :cin], xh[:, cin:])           # (4, Cin_p): 0,1 left; 2,3 right

    # ---- Conv1d #1 as one fused im2col matmul.  h is computed for the
    #      TILE+2 positions [t0-1, t0+TILE+1) so conv #2 has its 1-row halo
    #      in-tile.  Band b of read row R+i holds pooled[t0-1+i-1+b].
    for band in range(3):
        base = R - band
        lo = band * cin
        xc_ref[pl.ds(base, 2), pl.ds(lo, cin)] = halo[0:2]
        xc_ref[pl.ds(base + 2, tile), pl.ds(lo, cin)] = pooled
        xc_ref[pl.ds(base + 2 + tile, 2), pl.ds(lo, cin)] = halo[2:4]

    a1 = xc_ref[pl.ds(R, tile + 2), :]                     # (TILE+2, 3*Cin_p) bf16
    h = jnp.dot(a1, w1_ref[...], preferred_element_type=jnp.float32) + b1_ref[...]
    h = jnp.maximum(h, 0.0)
    # Zero h rows whose positions fall outside [0, Th): the conv-padding rows of
    # the second conv and any right tile-padding rows.  (Pooled padding cells
    # are already zero from the wrapper-side zero pad.)
    pos = k * tile - 1 + lax.broadcasted_iota(jnp.int32, (tile + 2, 1), 0)
    h = jnp.where((pos >= 0) & (pos < th_true), h, 0.0).astype(jnp.bfloat16)

    # ---- Conv1d #2, same trick on the hidden activation ----
    for band in range(3):
        base = R - band
        lo = band * cout
        hc_ref[pl.ds(base, tile + 2), pl.ds(lo, cout)] = h

    a2 = hc_ref[pl.ds(R, tile), :]                         # (TILE, 3*Cout_p) bf16
    y = jnp.dot(a2, w2_ref[...], preferred_element_type=jnp.float32) + b2_ref[...]
    o_ref[0] = jnp.maximum(y, 0.0).astype(o_ref.dtype)


def _fold_bn_into_conv(w, b, g, be, m, v, cin_pad, cout_pad, eps):
    """Fold eval-mode BN into a Conv1d(k=3); lane-pad; return (3*Cin_p, Cout_p) bf16."""
    cout, cin, _ = w.shape
    s = (g / jnp.sqrt(v + eps)).astype(jnp.float32)
    wf = w.astype(jnp.float32) * s[:, None, None]
    bf = s * (b.astype(jnp.float32) - m) + be
    wf = jnp.pad(wf, ((0, cout_pad - cout), (0, cin_pad - cin), (0, 0)))
    bf = jnp.pad(bf, (0, cout_pad - cout))
    wf = jnp.transpose(wf, (2, 1, 0)).reshape(3 * cin_pad, cout_pad)
    return wf.astype(jnp.bfloat16), bf.reshape(1, cout_pad).astype(jnp.float32)


def down_pallas(x_nct, params, eps=1e-5, tile_t=512):
    """x_nct: (N, Cin, T) float32 -> (N, Cout, T//2) float32."""
    N, Cin, T = x_nct.shape
    Th = T // 2
    Cout = params["w1"].shape[0]
    Cin_p = _round_up(Cin, _LANE)
    Cout_p = _round_up(Cout, _LANE)

    # T tile: multiple of 8 rows, capped so a tile's working set stays small.
    tile = min(_round_up(tile_t, 8), _round_up(max(Th, 1), 8))
    num_tiles = pl.cdiv(Th, tile)
    Th_p = num_tiles * tile

    # ---- fold BN, lane-pad and reorder weights (trace time only) ----
    w1f, b1f = _fold_bn_into_conv(params["w1"], params["b1"], params["g1"],
                                  params["be1"], params["m1"], params["v1"],
                                  Cin_p, Cout_p, eps)
    w2f, b2f = _fold_bn_into_conv(params["w2"], params["b2"], params["g2"],
                                  params["be2"], params["m2"], params["v2"],
                                  Cout_p, Cout_p, eps)

    # ---- layout: NCT -> NTC once, lane-pad Cin, pack time pairs on lanes so
    #      MaxPool1d(2) is a single in-kernel max of two lane bands ----
    # TODO(synk): keep the model NTC / lane-padded end-to-end to drop these transposes.
    x_ntc = jnp.transpose(x_nct[:, :, :2 * Th], (0, 2, 1)).astype(jnp.bfloat16)
    x_ntc = jnp.pad(x_ntc, ((0, 0), (0, 0), (0, Cin_p - Cin)))
    x_pairs = x_ntc.reshape(N, Th, 2 * Cin_p)
    x_pairs = jnp.pad(x_pairs, ((0, 0), (0, Th_p - Th), (0, 0)))   # zero tile pad

    # per-tile 2-row pooled halos: positions {t0-2, t0-1, t0+tile, t0+tile+1},
    # zero outside [0, Th) (true conv padding).
    x_hpad = jnp.pad(x_pairs, ((0, 0), (2, 2), (0, 0)))
    halo_idx = (jnp.arange(num_tiles)[:, None] * tile
                + jnp.array([0, 1, tile + 2, tile + 3])[None, :])
    x_halo = x_hpad[:, halo_idx, :]                                # (N, nt, 4, 2*Cin_p)

    sr = _round_up(tile + 20, 16)                                  # scratch rows
    const = lambda shape: pl.BlockSpec(shape, lambda n, k: tuple(0 for _ in shape))

    out = pl.pallas_call(
        functools.partial(_down_kernel, th_true=Th),
        out_shape=jax.ShapeDtypeStruct((N, Th_p, Cout_p), jnp.float32),
        grid_spec=pltpu.PrefetchScalarGridSpec(
            num_scalar_prefetch=0,
            grid=(N, num_tiles),
            in_specs=[
                pl.BlockSpec((1, tile, 2 * Cin_p), lambda n, k: (n, k, 0)),
                pl.BlockSpec((1, 1, 4, 2 * Cin_p), lambda n, k: (n, k, 0, 0)),
                const((3 * Cin_p, Cout_p)), const((1, Cout_p)),
                const((3 * Cout_p, Cout_p)), const((1, Cout_p)),
            ],
            out_specs=pl.BlockSpec((1, tile, Cout_p), lambda n, k: (n, k, 0)),
            scratch_shapes=[
                pltpu.VMEM((sr, 3 * Cin_p), jnp.bfloat16),
                pltpu.VMEM((sr, 3 * Cout_p), jnp.bfloat16),
            ],
        ),
        compiler_params=pltpu.CompilerParams(
            dimension_semantics=("parallel", "parallel"),
            vmem_limit_bytes=48 * 1024 * 1024,
        ),
    )(x_pairs, x_halo, w1f, b1f, w2f, b2f)

    return jnp.transpose(out[:, :Th, :Cout], (0, 2, 1))            # (N, Cout, Th)


def down_reference(x_nct, params, eps=1e-5):
    """Pure-JAX f32 reference (eval-mode BN) for validation."""
    N, Cin, T = x_nct.shape
    Th = T // 2
    x = jnp.max(x_nct[:, :, :2 * Th].reshape(N, Cin, Th, 2), axis=-1)  # MaxPool1d(2)

    def conv1d(x, w, b):
        y = lax.conv_general_dilated(
            x, w, window_strides=(1,), padding=[(1, 1)],
            dimension_numbers=("NCH", "OIH", "NCH"))
        return y + b[None, :, None]

    def bn(x, g, be, m, v):
        return (x - m[None, :, None]) / jnp.sqrt(v[None, :, None] + eps) \
            * g[None, :, None] + be[None, :, None]

    h = conv1d(x, params["w1"], params["b1"])
    h = jax.nn.relu(bn(h, params["g1"], params["be1"], params["m1"], params["v1"]))
    y = conv1d(h, params["w2"], params["b2"])
    y = jax.nn.relu(bn(y, params["g2"], params["be2"], params["m2"], params["v2"]))
    return y


def make_params(key, in_channels, out_channels):
    ks = jax.random.split(key, 12)
    return {
        "w1": 0.2 * jax.random.normal(ks[0], (out_channels, in_channels, 3), jnp.float32),
        "b1": 0.1 * jax.random.normal(ks[1], (out_channels,), jnp.float32),
        "g1": 1.0 + 0.1 * jax.random.normal(ks[2], (out_channels,), jnp.float32),
        "be1": 0.1 * jax.random.normal(ks[3], (out_channels,), jnp.float32),
        "m1": 0.1 * jax.random.normal(ks[4], (out_channels,), jnp.float32),
        "v1": 0.5 + jnp.abs(jax.random.normal(ks[5], (out_channels,), jnp.float32)) * 0.2,
        "w2": 0.2 * jax.random.normal(ks[6], (out_channels, out_channels, 3), jnp.float32),
        "b2": 0.1 * jax.random.normal(ks[7], (out_channels,), jnp.float32),
        "g2": 1.0 + 0.1 * jax.random.normal(ks[8], (out_channels,), jnp.float32),
        "be2": 0.1 * jax.random.normal(ks[9], (out_channels,), jnp.float32),
        "m2": 0.1 * jax.random.normal(ks[10], (out_channels,), jnp.float32),
        "v2": 0.5 + jnp.abs(jax.random.normal(ks[11], (out_channels,), jnp.float32)) * 0.2,
    }


if __name__ == "__main__":
    key = jax.random.PRNGKey(0)
    k_x, k_p = jax.random.split(key)

    N, Cin, Cout, T = 2, 4, 32, 16
    x = jax.random.normal(k_x, (N, Cin, T), jnp.float32)
    params = make_params(k_p, Cin, Cout)

    out = jax.block_until_ready(down_pallas(x, params))
    ref = jax.block_until_ready(down_reference(x, params))

    assert out.shape == (N, Cout, T // 2)
    err = jnp.max(jnp.abs(out - ref))
    # bf16 MXU operands (f32 accumulation) -> loosened tolerance vs. f32 reference.
    assert jnp.allclose(out, ref, rtol=5e-2, atol=5e-2), f"max abs err {err}"

    print("KERNEL_OK")
</pallas_src>

<mosaic_0001>
module attributes {stable_mosaic.version = 11 : i64} {
  func.func @_down_kernel(%arg0: i32, %arg1: i32, %arg2: memref<1x8x256xbf16, #tpu.memory_space<vmem>>, %arg3: memref<1x1x4x256xbf16, #tpu.memory_space<vmem>>, %arg4: memref<384x128xbf16, #tpu.memory_space<vmem>>, %arg5: memref<1x128xf32, #tpu.memory_space<vmem>>, %arg6: memref<384x128xbf16, #tpu.memory_space<vmem>>, %arg7: memref<1x128xf32, #tpu.memory_space<vmem>>, %arg8: memref<1x8x128xf32, #tpu.memory_space<vmem>>, %arg9: memref<32x384xbf16, #tpu.memory_space<vmem>>, %arg10: memref<32x384xbf16, #tpu.memory_space<vmem>>) attributes {dimension_semantics = [#tpu.dimension_semantics<parallel>, #tpu.dimension_semantics<parallel>], iteration_bounds = array<i64: 2, 1>, scalar_prefetch = 0 : i64, scratch_operands = 2 : i64, tpu.core_type = #tpu.core_type<tc>, window_params = [{transform_indices = @transform_0, window_bounds = array<i64: 1, 8, 256>}, {transform_indices = @transform_1, window_bounds = array<i64: 1, 1, 4, 256>}, {pipeline_mode = #tpu.pipeline_mode<synchronous>, transform_indices = @transform_2, window_bounds = array<i64: 384, 128>}, {pipeline_mode = #tpu.pipeline_mode<synchronous>, transform_indices = @transform_3, window_bounds = array<i64: 1, 128>}, {pipeline_mode = #tpu.pipeline_mode<synchronous>, transform_indices = @transform_4, window_bounds = array<i64: 384, 128>}, {pipeline_mode = #tpu.pipeline_mode<synchronous>, transform_indices = @transform_5, window_bounds = array<i64: 1, 128>}, {transform_indices = @transform_6, window_bounds = array<i64: 1, 8, 128>}]} {
    %c0 = arith.constant 0 : index
    %c0_0 = arith.constant 0 : index
    %c0_1 = arith.constant 0 : index
    %0 = vector.load %arg2[%c0, %c0_0, %c0_1] : memref<1x8x256xbf16, #tpu.memory_space<vmem>>, vector<1x8x256xbf16>
    %1 = vector.shape_cast %0 : vector<1x8x256xbf16> to vector<8x256xbf16>
    %c0_2 = arith.constant 0 : index
    %c0_3 = arith.constant 0 : index
    %c0_4 = arith.constant 0 : index
    %c0_5 = arith.constant 0 : index
    %2 = vector.load %arg3[%c0_2, %c0_3, %c0_4, %c0_5] : memref<1x1x4x256xbf16, #tpu.memory_space<vmem>>, vector<1x1x4x256xbf16>
    %3 = vector.shape_cast %2 : vector<1x1x4x256xbf16> to vector<4x256xbf16>
    %4 = vector.extract_strided_slice %1 {offsets = [0, 0], sizes = [8, 128], strides = [1, 1]} : vector<8x256xbf16> to vector<8x128xbf16>
    %5 = vector.extract_strided_slice %1 {offsets = [0, 128], sizes = [8, 128], strides = [1, 1]} : vector<8x256xbf16> to vector<8x128xbf16>
    %6 = arith.maximumf %4, %5 : vector<8x128xbf16>
    %7 = vector.extract_strided_slice %3 {offsets = [0, 0], sizes = [4, 128], strides = [1, 1]} : vector<4x256xbf16> to vector<4x128xbf16>
    %8 = vector.extract_strided_slice %3 {offsets = [0, 128], sizes = [4, 128], strides = [1, 1]} : vector<4x256xbf16> to vector<4x128xbf16>
    %9 = arith.maximumf %7, %8 : vector<4x128xbf16>
    %10 = vector.extract_strided_slice %9 {offsets = [0, 0], sizes = [2, 128], strides = [1, 1]} : vector<4x128xbf16> to vector<2x128xbf16>
    %c16 = arith.constant 16 : index
    %c0_6 = arith.constant 0 : index
    %11 = vector.load %arg9[%c16, %c0_6] : memref<32x384xbf16, #tpu.memory_space<vmem>>, vector<2x128xbf16>
    tpu.vector_store %arg9[%c16, %c0_6], %10 {strides = array<i32>} : memref<32x384xbf16, #tpu.memory_space<vmem>>, vector<2x128xbf16>,
    %c18 = arith.constant 18 : index
    %c0_7 = arith.constant 0 : index
    %12 = vector.load %arg9[%c18, %c0_7] : memref<32x384xbf16, #tpu.memory_space<vmem>>, vector<8x128xbf16>
    tpu.vector_store %arg9[%c18, %c0_7], %6 {strides = array<i32>} : memref<32x384xbf16, #tpu.memory_space<vmem>>, vector<8x128xbf16>,
    %13 = vector.extract_strided_slice %9 {offsets = [2, 0], sizes = [2, 128], strides = [1, 1]} : vector<4x128xbf16> to vector<2x128xbf16>
    %c26 = arith.constant 26 : index
    %c0_8 = arith.constant 0 : index
    %14 = vector.load %arg9[%c26, %c0_8] : memref<32x384xbf16, #tpu.memory_space<vmem>>, vector<2x128xbf16>
    tpu.vector_store %arg9[%c26, %c0_8], %13 {strides = array<i32>} : memref<32x384xbf16, #tpu.memory_space<vmem>>, vector<2x128xbf16>,
    %15 = vector.extract_strided_slice %9 {offsets = [0, 0], sizes = [2, 128], strides = [1, 1]} : vector<4x128xbf16> to vector<2x128xbf16>
    %c15 = arith.constant 15 : index
    %c128 = arith.constant 128 : index
    %16 = vector.load %arg9[%c15, %c128] : memref<32x384xbf16, #tpu.memory_space<vmem>>, vector<2x128xbf16>
    tpu.vector_store %arg9[%c15, %c128], %15 {strides = array<i32>} : memref<32x384xbf16, #tpu.memory_space<vmem>>, vector<2x128xbf16>,
    %c17 = arith.constant 17 : index
    %c128_9 = arith.constant 128 : index
    %17 = vector.load %arg9[%c17, %c128_9] : memref<32x384xbf16, #tpu.memory_space<vmem>>, vector<8x128xbf16>
    tpu.vector_store %arg9[%c17, %c128_9], %6 {strides = array<i32>} : memref<32x384xbf16, #tpu.memory_space<vmem>>, vector<8x128xbf16>,
    %18 = vector.extract_strided_slice %9 {offsets = [2, 0], sizes = [2, 128], strides = [1, 1]} : vector<4x128xbf16> to vector<2x128xbf16>
    %c25 = arith.constant 25 : index
    %c128_10 = arith.constant 128 : index
    %19 = vector.load %arg9[%c25, %c128_10] : memref<32x384xbf16, #tpu.memory_space<vmem>>, vector<2x128xbf16>
    tpu.vector_store %arg9[%c25, %c128_10], %18 {strides = array<i32>} : memref<32x384xbf16, #tpu.memory_space<vmem>>, vector<2x128xbf16>,
    %20 = vector.extract_strided_slice %9 {offsets = [0, 0], sizes = [2, 128], strides = [1, 1]} : vector<4x128xbf16> to vector<2x128xbf16>
    %c14 = arith.constant 14 : index
    %c256 = arith.constant 256 : index
    %21 = vector.load %arg9[%c14, %c256] : memref<32x384xbf16, #tpu.memory_space<vmem>>, vector<2x128xbf16>
    tpu.vector_store %arg9[%c14, %c256], %20 {strides = array<i32>} : memref<32x384xbf16, #tpu.memory_space<vmem>>, vector<2x128xbf16>,
    %c16_11 = arith.constant 16 : index
    %c256_12 = arith.constant 256 : index
    %22 = vector.load %arg9[%c16_11, %c256_12] : memref<32x384xbf16, #tpu.memory_space<vmem>>, vector<8x128xbf16>
    tpu.vector_store %arg9[%c16_11, %c256_12], %6 {strides = array<i32>} : memref<32x384xbf16, #tpu.memory_space<vmem>>, vector<8x128xbf16>,
    %23 = vector.extract_strided_slice %9 {offsets = [2, 0], sizes = [2, 128], strides = [1, 1]} : vector<4x128xbf16> to vector<2x128xbf16>
    %c24 = arith.constant 24 : index
    %c256_13 = arith.constant 256 : index
    %24 = vector.load %arg9[%c24, %c256_13] : memref<32x384xbf16, #tpu.memory_space<vmem>>, vector<2x128xbf16>
    tpu.vector_store %arg9[%c24, %c256_13], %23 {strides = array<i32>} : memref<32x384xbf16, #tpu.memory_space<vmem>>, vector<2x128xbf16>,
    %c16_14 = arith.constant 16 : index
    %c0_15 = arith.constant 0 : index
    %25 = vector.load %arg9[%c16_14, %c0_15] : memref<32x384xbf16, #tpu.memory_space<vmem>>, vector<10x384xbf16>
    %c0_16 = arith.constant 0 : index
    %c0_17 = arith.constant 0 : index
    %26 = vector.load %arg4[%c0_16, %c0_17] : memref<384x128xbf16, #tpu.memory_space<vmem>>, vector<384x128xbf16>
    %cst = arith.constant dense<0.000000e+00> : vector<10x128xf32>
    %27 = tpu.matmul %25, %26, %cst {dimension_numbers = #tpu.dot_dimension_numbers<[1], [0], [0], [1], [0, 0, 1, 1], [], []>} : vector<10x384xbf16>, vector<384x128xbf16>, vector<10x128xf32> -> vector<10x128xf32>
    %c0_18 = arith.constant 0 : index
    %c0_19 = arith.constant 0 : index
    %28 = vector.load %arg5[%c0_18, %c0_19] : memref<1x128xf32, #tpu.memory_space<vmem>>, vector<1x128xf32>
    %29 = vector.broadcast %28 : vector<1x128xf32> to vector<10x128xf32>
    %30 = arith.addf %27, %29 : vector<10x128xf32>
    %cst_20 = arith.constant 0.000000e+00 : f32
    %31 = vector.broadcast %cst_20 : f32 to vector<10x128xf32>
    %32 = arith.maximumf %30, %31 : vector<10x128xf32>
    %c8_i32 = arith.constant 8 : i32
    %33 = arith.muli %arg1, %c8_i32 : i32
    %c1_i32 = arith.constant 1 : i32
    %34 = arith.subi %33, %c1_i32 : i32
    %35 = tpu.iota {dimensions = array<i32: 0>} : vector<10x1xi32>
    %36 = vector.broadcast %34 : i32 to vector<10x1xi32>
    %37 = arith.addi %36, %35 : vector<10x1xi32>
    %c0_i32 = arith.constant 0 : i32
    %38 = vector.broadcast %c0_i32 : i32 to vector<10x1xi32>
    %39 = arith.cmpi sge, %37, %38 : vector<10x1xi32>
    %c8_i32_21 = arith.constant 8 : i32
    %40 = vector.broadcast %c8_i32_21 : i32 to vector<10x1xi32>
    %41 = arith.cmpi slt, %37, %40 : vector<10x1xi32>
    %42 = arith.andi %39, %41 : vector<10x1xi1>
    %cst_22 = arith.constant 0.000000e+00 : f32
    %43 = vector.shape_cast %42 : vector<10x1xi1> to vector<10x1xi1>
    %44 = vector.broadcast %43 : vector<10x1xi1> to vector<10x128xi1>
    %45 = vector.broadcast %cst_22 : f32 to vector<10x128xf32>
    %46 = arith.select %44, %32, %45 : vector<10x128xi1>, vector<10x128xf32>
    %47 = arith.truncf %46 : vector<10x128xf32> to vector<10x128xbf16>
    %c16_23 = arith.constant 16 : index
    %c0_24 = arith.constant 0 : index
    %48 = vector.load %arg10[%c16_23, %c0_24] : memref<32x384xbf16, #tpu.memory_space<vmem>>, vector<10x128xbf16>
    tpu.vector_store %arg10[%c16_23, %c0_24], %47 {strides = array<i32>} : memref<32x384xbf16, #tpu.memory_space<vmem>>, vector<10x128xbf16>,
    %c15_25 = arith.constant 15 : index
    %c128_26 = arith.constant 128 : index
    %49 = vector.load %arg10[%c15_25, %c128_26] : memref<32x384xbf16, #tpu.memory_space<vmem>>, vector<10x128xbf16>
    tpu.vector_store %arg10[%c15_25, %c128_26], %47 {strides = array<i32>} : memref<32x384xbf16, #tpu.memory_space<vmem>>, vector<10x128xbf16>,
    %c14_27 = arith.constant 14 : index
    %c256_28 = arith.constant 256 : index
    %50 = vector.load %arg10[%c14_27, %c256_28] : memref<32x384xbf16, #tpu.memory_space<vmem>>, vector<10x128xbf16>
    tpu.vector_store %arg10[%c14_27, %c256_28], %47 {strides = array<i32>} : memref<32x384xbf16, #tpu.memory_space<vmem>>, vector<10x128xbf16>,
    %c16_29 = arith.constant 16 : index
    %c0_30 = arith.constant 0 : index
    %51 = vector.load %arg10[%c16_29, %c0_30] : memref<32x384xbf16, #tpu.memory_space<vmem>>, vector<8x384xbf16>
    %c0_31 = arith.constant 0 : index
    %c0_32 = arith.constant 0 : index
    %52 = vector.load %arg6[%c0_31, %c0_32] : memref<384x128xbf16, #tpu.memory_space<vmem>>, vector<384x128xbf16>
    %cst_33 = arith.constant dense<0.000000e+00> : vector<8x128xf32>
    %53 = tpu.matmul %51, %52, %cst_33 {dimension_numbers = #tpu.dot_dimension_numbers<[1], [0], [0], [1], [0, 0, 1, 1], [], []>} : vector<8x384xbf16>, vector<384x128xbf16>, vector<8x128xf32> -> vector<8x128xf32>
    %c0_34 = arith.constant 0 : index
    %c0_35 = arith.constant 0 : index
    %54 = vector.load %arg7[%c0_34, %c0_35] : memref<1x128xf32, #tpu.memory_space<vmem>>, vector<1x128xf32>
    %55 = vector.broadcast %54 : vector<1x128xf32> to vector<8x128xf32>
    %56 = arith.addf %53, %55 : vector<8x128xf32>
    %cst_36 = arith.constant 0.000000e+00 : f32
    %57 = vector.broadcast %cst_36 : f32 to vector<8x128xf32>
    %58 = arith.maximumf %56, %57 : vector<8x128xf32>
    %c0_37 = arith.constant 0 : index
    %c0_38 = arith.constant 0 : index
    %c0_39 = arith.constant 0 : index
    %59 = vector.load %arg8[%c0_37, %c0_38, %c0_39] : memref<1x8x128xf32, #tpu.memory_space<vmem>>, vector<1x8x128xf32>
    %60 = vector.shape_cast %59 : vector<1x8x128xf32> to vector<8x128xf32>
    %61 = vector.shape_cast %58 : vector<8x128xf32> to vector<1x8x128xf32>
    tpu.vector_store %arg8[%c0_37, %c0_38, %c0_39], %61 {strides = array<i32>} : memref<1x8x128xf32, #tpu.memory_space<vmem>>, vector<1x8x128xf32>,
    return
  }
  func.func @transform_0(%arg0: i32, %arg1: i32) -> (i32, i32, i32) {
    %c0_i32 = arith.constant 0 : i32
    %c0_i32_0 = arith.constant 0 : i32
    return %arg0, %arg1, %c0_i32 : i32, i32, i32
  }
  func.func @transform_1(%arg0: i32, %arg1: i32) -> (i32, i32, i32, i32) {
    %c0_i32 = arith.constant 0 : i32
    %c0_i32_0 = arith.constant 0 : i32
    %c0_i32_1 = arith.constant 0 : i32
    return %arg0, %arg1, %c0_i32, %c0_i32_0 : i32, i32, i32, i32
  }
  func.func @transform_2(%arg0: i32, %arg1: i32) -> (i32, i32) {
    %c0_i32 = arith.constant 0 : i32
    %c0_i32_0 = arith.constant 0 : i32
    %c0_i32_1 = arith.constant 0 : i32
    return %c0_i32, %c0_i32_0 : i32, i32
  }
  func.func @transform_3(%arg0: i32, %arg1: i32) -> (i32, i32) {
    %c0_i32 = arith.constant 0 : i32
    %c0_i32_0 = arith.constant 0 : i32
    %c0_i32_1 = arith.constant 0 : i32
    return %c0_i32, %c0_i32_0 : i32, i32
  }
  func.func @transform_4(%arg0: i32, %arg1: i32) -> (i32, i32) {
    %c0_i32 = arith.constant 0 : i32
    %c0_i32_0 = arith.constant 0 : i32
    %c0_i32_1 = arith.constant 0 : i32
    return %c0_i32, %c0_i32_0 : i32, i32
  }
  func.func @transform_5(%arg0: i32, %arg1: i32) -> (i32, i32) {
    %c0_i32 = arith.constant 0 : i32
    %c0_i32_0 = arith.constant 0 : i32
    %c0_i32_1 = arith.constant 0 : i32
    return %c0_i32, %c0_i32_0 : i32, i32
  }
  func.func @transform_6(%arg0: i32, %arg1: i32) -> (i32, i32, i32) {
    %c0_i32 = arith.constant 0 : i32
    %c0_i32_0 = arith.constant 0 : i32
    return %arg0, %arg1, %c0_i32 : i32, i32, i32
  }
}

</mosaic_0001>

<bundles_post_ra>
// kernel: tpu_custom_call.1
= control target key start
LH: loop header
LB: loop body
LE: loop exit
PB: predicated region body
PF: predicated region fallthrough
CT: control target
= control target key end

     0   :  { %s1989_s0 = inlined_call_operand.hbm [shape: bf16[2,8,256], index: 0, kind: input, shape index: {}]   ;;  %s1990_s1 = inlined_call_operand.hbm [shape: bf16[2,1,4,256], index: 1, kind: input, shape index: {}]   ;;  %s1991_s2 = inlined_call_operand.hbm [shape: bf16[384,128], index: 2, kind: input, shape index: {}]   ;;  %s1992_s3 = inlined_call_operand.vmem [shape: f32[1,128], index: 3, kind: input, shape index: {}]   ;;  %s1993_s4 = inlined_call_operand.hbm [shape: bf16[384,128], index: 4, kind: input, shape index: {}]   ;;  %s1994_s5 = inlined_call_operand.vmem [shape: f32[1,128], index: 5, kind: input, shape index: {}]   ;;  %s1995_s6 = inlined_call_operand.hbm [shape: f32[2,8,128], index: 6, kind: output, shape index: {}]  }
   0x1   :  { %2002 = sst [smem:[#allocation24_spill]] %s1991_s2 }
   0x2   :  { %2003 = sst [smem:[#allocation25_spill]] %s1993_s4 }
   0x3   :  { %11 = vsyncpa [#allocation5], 0 }
   0x4   :  { %13 = vsyncpa [#allocation5 + $0x1], 0 }
   0x5   :  { %14 = vsyncpa [#allocation8], 0 }
   0x6   :  { %16 = vsyncpa [#allocation8 + $0x1], 0 }
   0x7   :  { %17 = vsyncpa [#allocation11], 0 }
   0x8   :  { %18 = vsyncpa [#allocation6], 0 }
   0x9   :  { %20 = vsyncpa [#allocation6 + $0x1], 0  ;;  %s1797_s21 = smov 0   ;;  %s1799_s22 = smov 0  }
   0xa   :  { %s1801_s23 = smov 0   ;;  %s1803_s24 = smov 0  }
   0xb   :  { %s1805_s25 = smov 0   ;;  %s1807_s26 = smov 0  }
   0xc LB: > { %2004 = sst [smem:[#allocation18_spill]] %s1736_s21  ;;  %s1828_s27 = sadd.s32 4294967295, %s1756_s26   ;;  %s1756_s26 = sphi %s1807_s26, %s26_s26   ;;  %s1752_s25 = sphi %s1805_s25, %s2030_s25   ;;  %s1748_s24 = sphi %s1803_s24, %s2029_s24   ;;  %s1744_s23 = sphi %s1801_s23, %s2025_s23   ;;  %s1740_s22 = sphi %s1799_s22, %s2028_s22   ;;  %s1736_s21 = sphi %s1797_s21, %s2027_s21  }
   0xd   : > { %2005 = sst [smem:[#allocation19_spill]] %s1744_s23  ;;  %p1172_p0 = scmp.ge.s32.totalorder %s1756_s26, 1 }
   0xe   : > { %p61_p1 = scmp.eq.s32.totalorder %s1828_s27, 0  ;;  %p211_p2 = scmp.lt.s32.totalorder %s1756_s26, 3 }
   0xf   : > { %s2006_s2 = sld [smem:[#allocation24_spill]]  ;;  %s1758_s8 = smov [#allocation9]  }
  0x10   : > { %p1836_p3 = pnand %p1172_p0, %p211_p2  ;;  %s224_s9 = sshll.u32 %s1758_s8, 4  ;;  %s225_s9 = int_to_ptr.vmem [resolvable:$true] %s224_s9 }
  0x11   : > { %p1175_p6 = scmp.ge.s32.totalorder %s1756_s26, 2  ;;  %s2008_s4 = sld [smem:[#allocation25_spill]] }
  0x12   : > { %p1464_p4 = pneg %p1836_p3  ;;  %s1759_s13 = smov 64  }
  0x13   : > { %s1760_s14 = smov 4   ;;  %s1761_s15 = smov [#allocation10]  }
  0x14   : > { %p1465_p5 = pnand %p1464_p4, %p61_p1  ;;  %s241_s16 = sshll.u32 %s1761_s15, 4  ;;  %s242_s16 = int_to_ptr.vmem [resolvable:$true] %s241_s16 }
  0x15   : > { %s222_s30 = sshll.u32 %s2006_s2, 4  ;;  %s1171_s17 = sadd.s32 4294967294, %s1756_s26   ;;  %s223_s30 = int_to_ptr.hbm [resolvable:$true] %s222_s30 }
  0x16   : > { %1467 = dma.hbm_to_vmem [thread:$0]  (!%p1465_p5), %s223_s30, 3072, %s225_s9, [#allocation8], %s1759_s13, %s1759_s13, %s1760_s14  }
  0x17   : > { %s239_s12 = sshll.u32 %s2008_s4, 4  ;;  %s38_s18 = sadd.s32 1, %s1752_s25  ;;  %s240_s12 = int_to_ptr.hbm [resolvable:$true] %s239_s12 }
  0x18   : > { %1470 = dma.hbm_to_vmem [thread:$0]  (!%p1465_p5), %s240_s12, 3072, %s242_s16, [#allocation11], %s1759_s13, %s1759_s13, %s1760_s14  }
  0x19   : > { %p40_p7 = scmp.ge.s32.totalorder %s38_s18, 2  ;;  %s47_s19 = sadd.s32 1, %s1744_s23 }
  0x1a   : > { %p54_p8 = scmp.ne.s32.totalorder %s1744_s23, %s1740_s22  ;;  %p55_p9 = scmp.eq.s32.totalorder %s1756_s26, 0 }
  0x1b   : > { %s2032_s18 = smov (%p40_p7, %s38_s18), 0  ;;  %p60_p11 = scmp.ne.s32.totalorder %s1740_s22, %s1736_s21 }
  0x1c   : > { %2009 = sst [smem:[#allocation20_spill]] %s2032_s18  ;;  %p1856_p10 = por %p55_p9, %p54_p8 }
  0x1d   : > { %s42_s28 = ssub.s32 %s1752_s25, %s2032_s18  ;;  %p198_p12 = scmp.eq.s32.totalorder %s1828_s27, 1 }
  0x1e   : > { %p45_p13 = scmp.eq.s32.totalorder %s42_s28, 0  ;;  %p1867_p0 = por %p61_p1, %p60_p11 }
  0x1f   : > { %p1871_p2 = por %p198_p12, %p54_p8  ;;  %p204_p4 = scmp.eq.s32.totalorder %s1171_s17, 1 }
  0x20   : > { %s1876_s8 = scalar_select %p45_p13, %s1744_s23, %s47_s19  }
  0x21   : > { %s2012_s30 = scalar_select %p1871_p2, 1, 0 }
  0x22   : > { %2014 = sst [smem:[#allocation22_spill]] %s1876_s8  ;;  %p1878_p5 = por %p204_p4, %p60_p11 }
  0x23   : > { %2013 = sst [smem:[#allocation21_spill]] %s2012_s30  ;;  %p1484_p7 = scmp.lt.s32.totalorder %s1756_s26, 2 }
  0x24   : > { %s2015_s9 = scalar_select %p1878_p5, 1, 0 }
  0x25   : > { %s258_s10 = sand.u32 1, %s1744_s23   ;;  %s1397_s11 = sshll.u32 %s1752_s25, 3 }
  0x26   : > { %2016 = sst [smem:[#allocation23_spill]] %s2015_s9  ;;  %s1176_s12 = sshll.u32 %s258_s10, 3 }
  0x27   : > { %s269_s15 = scalar_lea.hbm %s1989_s0, %s1397_s11  ;;  %s262_s28 = scalar_lea.vmem [#allocation4], %s1176_s12 }
  0x28   : > { %s271_s16 = sshll.u32 %s269_s15, 4  ;;  %s273_s2 = sshll.u32 %s262_s28, 4  ;;  %s272_s16 = int_to_ptr.hbm [resolvable:$true] %s271_s16  ;;  %s274_s2 = int_to_ptr.vmem [resolvable:$true] %s273_s2 }
  0x29   : > { %p1472_p8 = pnand %p1484_p7, %p1856_p10  ;;  %s280_s17 = sand.u32 1, %s1756_s26  }
  0x2a   : > { %s1179_s19 = sshll.u32 %s258_s10, 2  ;;  %s259_s4 = scalar_lea.sflag [#allocation5], %s258_s10 }
  0x2b   : > { %1474 = dma.hbm_to_vmem [thread:$0]  (!%p1472_p8), %s272_s16, 128, %s274_s2, %s259_s4  }
  0x2c   : > { %s1398_s18 = sshll.u32 %s1752_s25, 2  ;;  %s284_s8 = scalar_lea.vmem [#allocation7], %s1179_s19 }
  0x2d   : > { %s295_s23 = sshll.u32 %s284_s8, 4  ;;  %s291_s30 = scalar_lea.hbm %s1990_s1, %s1398_s18  ;;  %s296_s23 = int_to_ptr.vmem [resolvable:$true] %s295_s23 }
  0x2e   : > { %s293_s11 = sshll.u32 %s291_s30, 4  ;;  %s281_s12 = scalar_lea.sflag [#allocation8], %s280_s17  ;;  %s294_s11 = int_to_ptr.hbm [resolvable:$true] %s293_s11 }
  0x2f   : > { %1477 = dma.hbm_to_vmem [thread:$0]  (!%p1472_p8), %s294_s11, 64, %s296_s23, %s281_s12  }
  0x30   : > { %304 = sbr.rel (%p1836_p3) target bundleno = 403 (0x193), region = 44  ;;  %s1898_s20 = sand.u32 (!%p1836_p3), 1, %s1740_s22  }
  0x31   : > { %s1183_s2 = sshll.u32 (!%p1836_p3), %s1898_s20, 3  ;;  %s307_s4 = scalar_lea.sflag (!%p1836_p3), [#allocation5], %s1898_s20 }
  0x32   : > { %s310_s21 = scalar_lea.vmem (!%p1836_p3), [#allocation4], %s1183_s2 }
  0x35   : > { %1715 = dma.done.wait (%p1867_p0), %s307_s4, 128  }
  0x36   : > { %1717 = vsyncadd (%p1867_p0), %s307_s4, 4294967168  ;;  %s316_s23 = sand.u32 1, %s1828_s27   ;;  %s1184_s7 = sshll.u32 %s1898_s20, 2 }
  0x37   : > { %s317_s18 = scalar_lea.sflag [#allocation8], %s316_s23  ;;  %s320_s30 = scalar_lea.vmem [#allocation7], %s1184_s7 }
  0x38   : > { %1719 = dma.done.wait (%p1867_p0), %s317_s18, 64  }
  0x39   : > { %1721 = vsyncadd (%p1867_p0), %s317_s18, 4294967232 }
  0x3a   : > { %1723 = dma.done.wait (%p61_p1), [#allocation8], 3072  }
  0x3b   : > { %1725 = vsyncadd (%p61_p1), [#allocation8], 4294964224 }
  0x3c   : > { %1727 = dma.done.wait (%p61_p1), [#allocation11], 3072  }
  0x3d   : > { %1729 = vsyncadd (%p61_p1), [#allocation11], 4294964224  ;;  %v1409_v0 = vld [vmem:[#allocation9 + $0x38] sm:$0xff]  ;;  %v1408_v3 = vld [vmem:[#allocation9 + $0x30] sm:$0xff]  ;;  %vm406_vm0 = vcmask 1040384   ;;  %vm422_vm3 = vcmask 1043456  }
  0x3e   : > { %v1425_v1 = vld [vmem:[#allocation9 + $0xb8] sm:$0xff]  ;;  %664 = vmatpush.bf16.msra.mxu0 %v1409_v0  ;;  %v1424_v4 = vld [vmem:[#allocation9 + $0xb0] sm:$0xff]  ;;  %v1407_v6 = vld [vmem:[#allocation9 + $0x28] sm:$0xff]  ;;  %vm407_vm1 = vsmask.f32 256  ;;  %vm434_vm5 = vcmask 1041408  }
  0x3f   : > { %v1417_v2 = vld [vmem:[#allocation9 + $0x78] sm:$0xff]  ;;  %692 = vmatpush.bf16.msra.mxu2 %v1425_v1  ;;  %v1416_v5 = vld [vmem:[#allocation9 + $0x70] sm:$0xff]  ;;  %v1423_v7 = vld [vmem:[#allocation9 + $0xa8] sm:$0xff]  ;;  %vm423_vm4 = vsmask.f32 7938  ;;  %vm400_vm9 = vcmask 1043459  }
  0x40   : > { %678 = vmatpush.bf16.msra.mxu1 %v1417_v2  ;;  %v1415_v8 = vld [vmem:[#allocation9 + $0x68] sm:$0xff]  ;;  %v366_v10 = vld [vmem:[%s320_s30] sm:$0xf]  ;;  %v1406_v15 = vld [vmem:[#allocation9 + $0x20] sm:$0xff]  ;;  %vm435_vm6 = vsmask.f32 1282 }
  0x41   : > { %v365_v9 = vld [vmem:[%s310_s21] sm:$0xff]  ;;  %v374_v13 = vunpack.c.l.bf16 %v366_v10  ;;  %v376_v14 = vrot.slane %v366_v10, 2  ;;  %v1422_v16 = vld [vmem:[#allocation9 + $0xa0] sm:$0xff]  ;;  %v1405_v22 = vld [vmem:[#allocation9 + $0x18] sm:$0xff]  ;;  %vm401_vm10 = vsmask.f32 7950 }
  0x42   : > { %665 = vmatpush.bf16.msra.mxu0 %v1408_v3  ;;  %v367_v11 = vunpack.c.l.bf16 %v365_v9  ;;  %v369_v12 = vrot.slane %v365_v9, 4  ;;  %v1414_v17 = vld [vmem:[#allocation9 + $0x60] sm:$0xff]  ;;  %v1421_v23 = vld [vmem:[#allocation9 + $0x98] sm:$0xff]  ;;  %v1404_v31 = vld [vmem:[#allocation9 + $0x10] sm:$0xff]  ;;  %vm765_vm14 = vcmask 1042432   ;;  %vm766_vm15 = vcmask 1046532  }
  0x43   : > { %693 = vmatpush.bf16.msra.mxu2 %v1424_v4  ;;  %v378_v19 = vunpack.c.l.bf16 %v376_v14  ;;  %v1413_v24 = vld [vmem:[#allocation9 + $0x58] sm:$0xff]  ;;  %v1420_v32 = vld [vmem:[#allocation9 + $0x90] sm:$0xff]  ;;  %vm1924_vm2 = vmand %vm406_vm0, %vm407_vm1  ;;  %vm732_vm0 = vsmask.f32 3328  ;;  %vm733_vm1 = vsmask.f32 7440 }
  0x44   : > { %679 = vmatpush.bf16.msra.mxu1 %v1416_v5  ;;  %v371_v18 = vunpack.c.l.bf16 %v369_v12  ;;  %v1412_v34 = vld [vmem:[#allocation9 + $0x50] sm:$0xff]  ;;  %v409_v39 = vld [vmem:[#allocation2 + $0x1c] sm:$0x1]  ;;  %v1403_v44 = vld [vmem:[#allocation9 + $0x8] sm:$0xff]  ;;  %s1394_s10 = sshll.u32 %s1748_s24, 3  ;;  %s364_s28 = scalar_lea.vmem [#allocation12], %s1183_s2 }
  0x45   : > { %v379_v21 = vmax.f32 %v374_v13, %v378_v19  ;;  %v428_v43 = vld [vmem:[#allocation2 + $0x28] sm:$0x1]  ;;  %v1419_v45 = vld [vmem:[#allocation9 + $0x88] sm:$0xff]  ;;  %v1402_v52 = vld [vmem:[#allocation9] sm:$0xff]  ;;  %s1038_s15 = scalar_lea.hbm %s1995_s6, %s1394_s10  ;;  %s1040_s17 = sshll.u32 %s364_s28, 4  ;;  %s1041_s17 = int_to_ptr.vmem [resolvable:$true] %s1040_s17 }
  0x46   : > { %666 = vmatpush.bf16.msra.mxu0 %v1407_v6  ;;  %v372_v20 = vmax.f32 %v367_v11, %v371_v18  ;;  %v1411_v47 = vld [vmem:[#allocation9 + $0x48] sm:$0xff]  ;;  %v1418_v53 = vld [vmem:[#allocation9 + $0x80] sm:$0xff]  ;;  %vm424_vm7 = vmand %vm422_vm3, %vm423_vm4  ;;  %s1042_s19 = sshll.u32 %s1038_s15, 4  ;;  %s1027_s24 = scalar_lea.sflag [#allocation6], %s1898_s20  ;;  %s1043_s19 = int_to_ptr.hbm [resolvable:$true] %s1042_s19 }
  0x47   : > { %694 = vmatpush.bf16.msra.mxu2 %v1423_v7  ;;  %v380_v26 = vpack.c.bf16 %v379_v21, %v379_v21  ;;  %v1410_v55 = vld [vmem:[#allocation9 + $0x40] sm:$0xff]  ;;  %vm436_vm8 = vmand %vm434_vm5, %vm435_vm6  ;;  %v403_v6 = vld [vmem:[#allocation2 + $0x10] sm:$0x8]  ;;  %s1676_s11 = sshra.s32 %s1043_s19, 4  ;;  %s1682_s2 = scalar_lea.hbm %s1995_s6, 16  ;;  %s1677_s11 = int_to_ptr.hbm [resolvable:$true] %s1676_s11 }
  0x48   : > { %680 = vmatpush.bf16.msra.mxu1 %v1415_v8  ;;  %v373_v25 = vpack.c.bf16 %v372_v20, %v372_v20  ;;  %vm1933_vm11 = vmand %vm400_vm9, %vm401_vm10  ;;  %v1449_v8 = vld [vmem:[#allocation10 + $0xb8] sm:$0xff]  ;;  %v1448_v12 = vld [vmem:[#allocation10 + $0xb0] sm:$0xff]  ;;  %s1678_s12 = scalar_lea.hbm %s1677_s11, 8  ;;  %p1683_p10 = scmp.lt.s32.totalorder %s1677_s11, %s1995_s6 }
  0x49   : > { %381 = vst [vmem:[#allocation2 + $0x18] sm:$0x1] %v380_v26  ;;  %v441_v28 = vrot.slane %v380_v26, 5  ;;  %v391_v29 = vshll.u32 %v380_v26, 16  ;;  %v394_v30 = vshrl.u32 %v380_v26, 16  ;;  %v1433_v10 = vld [vmem:[#allocation10 + $0x38] sm:$0xff]  ;;  %vm767_vm3 = vmor %vm765_vm14, %vm766_vm15  ;;  %p1679_p1 = scmp.ne.s32.totalorder %s1677_s11, %s1678_s12  ;;  %p1684_p11 = scmp.lt.s32.totalorder %s1682_s2, %s1678_s12 }
  0x4a   : > { %667 = vmatpush.bf16.msra.mxu0 %v1406_v15  ;;  %v383_v27 = vrot.slane %v373_v25, 7  ;;  %v413_v33 = vshrl.u32 %v373_v25, 16  ;;  %444 = vst [vmem:[#allocation2 + $0x20] sm:$0xf] %v373_v25  ;;  %v416_v49 = vshll.u32 %v373_v25, 16  ;;  %v1441_v11 = vld [vmem:[#allocation10 + $0x78] sm:$0xff]  ;;  %985 = vmatpush.bf16.msra.mxu3 %v1433_v10  ;;  %vm734_vm4 = vmor %vm732_vm0, %vm733_vm1 }
  0x4b   : > { %695 = vmatpush.bf16.msra.mxu2 %v1422_v16  ;;  %v445_v36 = vrot.slane %v441_v28, 4  ;;  %v396_v37 = vrot.slane %v394_v30, 4  ;;  %v393_v41 = vrot.slane %v391_v29, 5  ;;  %v1432_v13 = vld [vmem:[#allocation10 + $0x30] sm:$0xff]  ;;  %v1447_v15 = vld [vmem:[#allocation10 + $0xa8] sm:$0xff]  ;;  %v1446_v18 = vld [vmem:[#allocation10 + $0xa0] sm:$0xff]  ;;  %v710_v28 = vlaneseq  ;;  %p1680_p3 = pnand %p1679_p1, %p1871_p2  ;;  %p1685_p12 = por %p1684_p11, %p1683_p10 }
  0x4c   : > { %681 = vmatpush.bf16.msra.mxu1 %v1414_v17  ;;  %v384_v35 = vrot.slane %v383_v27, 4  ;;  %387 = vst [vmem:[#allocation2 + $0x18] sm:$0xe] %v383_v27  ;;  %v415_v40 = vrot.slane %v413_v33, 7  ;;  %v1440_v14 = vld [vmem:[#allocation10 + $0x70] sm:$0xff]  ;;  %v1431_v16 = vld [vmem:[#allocation10 + $0x28] sm:$0xff] }
  0x4d   : > { %v397_v42 = vrot.slane %v396_v37, 4  ;;  %447 = vst [vmem:[#allocation2 + $0x2c] sm:$0x1] %v445_v36  ;;  %v431_v51 = vor.u32 %v396_v37, %v393_v41  ;;  %v404_v9 = vsel %vm1933_vm11, %v393_v41, %v403_v6  ;;  %v1439_v17 = vld [vmem:[#allocation10 + $0x68] sm:$0xff]  ;;  %v1430_v19 = vld [vmem:[#allocation10 + $0x20] sm:$0xff]  ;;  %v1445_v21 = vld [vmem:[#allocation10 + $0x98] sm:$0xff]  ;;  %p1681_p9 = pneg %p1680_p3 }
  0x4e   : > { %668 = vmatpush.bf16.msra.mxu0 %v1405_v22  ;;  %388 = vst [vmem:[#allocation2 + $0x24] sm:$0x1] %v384_v35  ;;  %v419_v46 = vrot.slane %v415_v40, 4  ;;  %v418_v58 = vor.u32 %v416_v49, %v415_v40  ;;  %986 = vmatpush.bf16.msra.mxu3 %v1432_v13  ;;  %v1438_v20 = vld [vmem:[#allocation10 + $0x60] sm:$0xff]  ;;  %v1429_v22 = vld [vmem:[#allocation10 + $0x18] sm:$0xff]  ;;  %v1428_v25 = vld [vmem:[#allocation10 + $0x10] sm:$0xff] }
  0x4f   : > { %696 = vmatpush.bf16.msra.mxu2 %v1421_v23  ;;  %v410_v48 = vsel %vm1924_vm2, %v397_v42, %v409_v39  ;;  %v432_v60 = vrot.slane %v431_v51, 4  ;;  %405 = vst [vmem:[#allocation2 + $0x10] sm:$0x8] %v404_v9  ;;  %v1437_v23 = vld [vmem:[#allocation10 + $0x58] sm:$0xff]  ;;  %v1436_v26 = vld [vmem:[#allocation10 + $0x50] sm:$0xff]  ;;  %v1443_v29 = vld [vmem:[#allocation10 + $0x88] sm:$0xff]  ;;  %p1686_p13 = pnand %p1685_p12, %p1681_p9 }
  0x50   : > { %682 = vmatpush.bf16.msra.mxu1 %v1413_v24  ;;  %411 = vst [vmem:[#allocation2 + $0x1c] sm:$0x1] %v410_v48  ;;  %v429_v50 = vsel %vm1924_vm2, %v419_v46, %v428_v43  ;;  %v1444_v24 = vld [vmem:[#allocation10 + $0x90] sm:$0xff]  ;;  %v1540_v30 = vld [vmem:[%s1992_s3] ss:$0 sm:$0xff]  ;;  %v711_v33 = vshrl.u32 %v710_v28, 7 }
  0x51   : > { %430 = vst [vmem:[#allocation2 + $0x28] sm:$0x1] %v429_v50  ;;  %v1198_v57 = vld [vmem:[#allocation2 + $0x20] sm:$0xf]  ;;  %v1426_v37 = vld [vmem:[#allocation10] sm:$0xff] }
  0x52   : > { %669 = vmatpush.bf16.msra.mxu0 %v1404_v31  ;;  %987 = vmatpush.bf16.msra.mxu3 %v1431_v16  ;;  %v1427_v31 = vld [vmem:[#allocation10 + $0x8] sm:$0xff]  ;;  %v1434_v39 = vld [vmem:[#allocation10 + $0x40] sm:$0xff]  ;;  %v714_v41 = vadd.s32 4294967295, %v711_v33 }
  0x53   : > { %697 = vmatpush.bf16.msra.mxu2 %v1420_v32  ;;  %v1190_v54 = vld [vmem:[#allocation2 + $0x18] sm:$0xf]  ;;  %v1435_v32 = vld [vmem:[#allocation10 + $0x48] sm:$0xff] }
  0x54   : > { %683 = vmatpush.bf16.msra.mxu1 %v1412_v34  ;;  %v1401_v61 = vld [vmem:[#allocation2 + $0x28] sm:$0x10]  ;;  %v1442_v34 = vld [vmem:[#allocation10 + $0x80] sm:$0xff]  ;;  %vm716_vm12 = vcmp.ge.s32.totalorder %v714_v41, 0 }
  0x55   : > { %v1400_v56 = vld [vmem:[#allocation2 + $0x20] sm:$0x10]  ;;  %v1199_v62 = vor.u32 %v1401_v61, %v1198_v57  ;;  %v756_v57 = vld [vmem:[#allocation3 + $0x10] sm:$0x8] }
  0x56   : > { %670 = vmatpush.bf16.msra.mxu0 %v1403_v44  ;;  %v1191_v59 = vor.u32 %v1400_v56, %v1190_v54  ;;  %988 = vmatpush.bf16.msra.mxu3 %v1430_v19 }
  0x57   : > { %698 = vmatpush.bf16.msra.mxu2 %v1419_v45  ;;  %v425_v63 = vld [vmem:[#allocation2 + $0x1c] sm:$0xf]  ;;  %v712_v45 = vadd.s32 8, %v711_v33 }
  0x58   : > { %684 = vmatpush.bf16.msra.mxu1 %v1411_v47  ;;  %v426_v0 = vsel %vm424_vm7, %v418_v58, %v425_v63  ;;  %v437_v1 = vld [vmem:[#allocation2 + $0x28] sm:$0x3] }
  0x59   : > { %427 = vst [vmem:[#allocation2 + $0x1c] sm:$0xf] %v426_v0  ;;  %v438_v2 = vsel %vm436_vm8, %v432_v60, %v437_v1 }
  0x5a   : > { %671 = vmatpush.bf16.msra.mxu0 %v1402_v52  ;;  %439 = vst [vmem:[#allocation2 + $0x28] sm:$0x3] %v438_v2  ;;  %989 = vmatpush.bf16.msra.mxu3 %v1429_v22  ;;  %v715_v52 = vadd.s32 4294967295, %v712_v45  ;;  %v760_v2 = vld [vmem:[#allocation3 + $0x28] sm:$0x1] }
  0x5b   : > { %699 = vmatpush.bf16.msra.mxu2 %v1418_v53 }
  0x5c   : > { %685 = vmatpush.bf16.msra.mxu1 %v1410_v55  ;;  %vm719_vm13 = vcmp.lt.s32.totalorder %v715_v52, 8 }
  0x5d   : > { %672 = vmatmul.bf16.vlgmr.msra.gmra.mxu0 %v1191_v59 }
  0x5e   : > { %700 = vmatmul.bf16.vlgmr.msra.gmra.mxu2 %v1199_v62  ;;  %998 = vmatpush.bf16.msrb.mxu0 %v1441_v11 }
  0x5f   : > { %990 = vmatpush.bf16.msra.mxu3 %v1428_v25 }
  0x60   : > { %v1399_v3 = vld [vmem:[#allocation2 + $0x1c] sm:$0xf]  ;;  %1011 = vmatpush.bf16.msrb.mxu1 %v1449_v8 }
  0x61   : > { %v1192_v4 = vld [vmem:[#allocation2 + $0x24] sm:$0x10] }
  0x62   : > { %v1195_v5 = vor.u32 %v1399_v3, %v1192_v4  ;;  %999 = vmatpush.bf16.msrb.mxu0 %v1440_v14 }
  0x63   : > { %991 = vmatpush.bf16.msra.mxu3 %v1427_v31 }
  0x64   : > { %686 = vmatmul.bf16.vlgmr.msra.gmra.mxu1 %v1195_v5 }
  0x65   : > { %1012 = vmatpush.bf16.msrb.mxu1 %v1448_v12 }
  0x66   : > { %1000 = vmatpush.bf16.msrb.mxu0 %v1439_v17 }
  0x67   : > { %992 = vmatpush.bf16.msra.mxu3 %v1426_v37 }
  0x69   : > { %1013 = vmatpush.bf16.msrb.mxu1 %v1447_v15 }
  0x6a   : > { %1001 = vmatpush.bf16.msrb.mxu0 %v1438_v20 }
  0x6d   : > { %1014 = vmatpush.bf16.msrb.mxu1 %v1446_v18 }
  0x6e   : > { %1002 = vmatpush.bf16.msrb.mxu0 %v1437_v23 }
  0x71   : > { %1015 = vmatpush.bf16.msrb.mxu1 %v1445_v21  ;;  %v1541_v21 = vld [vmem:[%s1994_s5] ss:$0 sm:$0xff] }
  0x72   : > { %1003 = vmatpush.bf16.msrb.mxu0 %v1436_v26 }
  0x75   : > { %1016 = vmatpush.bf16.msrb.mxu1 %v1444_v24 }
  0x76   : > { %1004 = vmatpush.bf16.msrb.mxu0 %v1435_v32 }
  0x79   : > { %1017 = vmatpush.bf16.msrb.mxu1 %v1443_v29 }
  0x7a   : > { %1005 = vmatpush.bf16.msrb.mxu0 %v1434_v39 }
  0x7d   : > { %1018 = vmatpush.bf16.msrb.mxu1 %v1442_v34 }
  0xda   : > { %v673_v27 = vpop.f32.mrf.mxu0 }
  0xdb   : > { %v674_v35 = vadd.f32 %v1540_v30, %v673_v27 }
  0xe1   : > { %v701_v36 = vpop.f32.mrf.mxu2  ;;  %v687_v40 = vpop.f32.mrf.mxu1 }
  0xe2   : > { %v688_v42 = vadd.f32 %v687_v40, %v674_v35  ;;  %v675_v43 = vpop.f32.mrf.mxu0 }
  0xe3   : > { %v676_v47 = vadd.f32 %v1540_v30, %v675_v43 }
  0xe4   : > { %v702_v44 = vadd.f32 %v701_v36, %v688_v42 }
  0xe6   : > { %v706_v46 = vmax.f32 %v702_v44, 0.0 }
  0xe8   : > { %v726_v48 = vsel %vm716_vm12, %v706_v46, 0.0 }
  0xe9   : > { %v728_v49 = vpack.c.bf16 %v726_v48, %v726_v48  ;;  %v689_v50 = vpop.f32.mrf.mxu1  ;;  %v703_v51 = vpop.f32.mrf.mxu2 }
  0xea   : > { %v690_v53 = vadd.f32 %v689_v50, %v676_v47 }
  0xeb   : > { %730 = vst [vmem:[#allocation3 + $0x18] sm:$0xf] %v728_v49  ;;  %v736_v54 = vshll.u32 %v728_v49, 16  ;;  %v739_v55 = vshrl.u32 %v728_v49, 16  ;;  %v768_v56 = vrot.slane %v728_v49, 5 }
  0xec   : > { %v704_v58 = vadd.f32 %v703_v51, %v690_v53 }
  0xed   : > { %v738_v59 = vrot.slane %v736_v54, 5  ;;  %v741_v60 = vrot.slane %v739_v55, 4  ;;  %v769_v3 = vrot.slane %v768_v56, 4 }
  0xee   : > { %v707_v61 = vmax.f32 %v704_v58, 0.0 }
  0xef   : > { %v757_v62 = vsel %vm1933_vm11, %v738_v59, %v756_v57  ;;  %v742_v0 = vor.u32 %v741_v60, %v738_v59 }
  0xf0   : > { %758 = vst [vmem:[#allocation3 + $0x10] sm:$0x8] %v757_v62  ;;  %v727_v63 = vsel %vm719_vm13, %v707_v61, 0.0 }
  0xf1   : > { %v729_v1 = vpack.c.bf16 %v727_v63, %v727_v63  ;;  %v743_v8 = vrot.slane %v742_v0, 4 }
  0xf3   : > { %v745_v4 = vshll.u32 %v729_v1, 16  ;;  %v749_v5 = vshrl.u32 %v729_v1, 16  ;;  %v770_v6 = vrot.slane %v729_v1, 5 }
  0xf5   : > { %v747_v9 = vrot.slane %v745_v4, 5  ;;  %v761_v7 = vsel %vm1924_vm2, %v749_v5, %v760_v2  ;;  %v771_v10 = vsel %vm767_vm3, %v769_v3, %v770_v6 }
  0xf6   : > { %762 = vst [vmem:[#allocation3 + $0x28] sm:$0x1] %v761_v7 }
  0xf7   : > { %v748_v11 = vsel %vm734_vm4, %v743_v8, %v747_v9  ;;  %775 = vst [vmem:[#allocation3 + $0x20] sm:$0xf] %v771_v10 }
  0xf8   : > { %759 = vst [vmem:[#allocation3 + $0x1c] sm:$0xf] %v748_v11 }
  0xfe   : > { %v777_v12 = vld [vmem:[#allocation3 + $0x20] sm:$0xf] }
  0xff   : > { %v834_v13 = vunpack.c.l.b16 %v777_v12  ;;  %v776_v14 = vld [vmem:[#allocation3 + $0x18] sm:$0xff] }
 0x100   : > { %v832_v15 = vunpack.c.l.b16 %v776_v14  ;;  %v833_v16 = vunpack.c.h.b16 %v776_v14 }
 0x101   : > { %v837_v17 = vpack.c.b16 %v834_v13, %v834_v13 }
 0x102   : > { %v835_v18 = vpack.c.b16 %v832_v15, %v832_v15  ;;  %v836_v19 = vpack.c.b16 %v833_v16, %v833_v16 }
 0x103   : > { %1019 = vmatmul.bf16.vlgmr.msrb.gmra.mxu1 %v837_v17 }
 0x104   : > { %993 = vmatmul.bf16.vlgmr.msra.gmra.mxu3 %v835_v18  ;;  %1006 = vmatmul.bf16.vlgmr.msrb.gmra.mxu0 %v836_v19 }
 0x180   : > { %v1020_v38 = vpop.f32.mrf.mxu1 }
 0x181   : > { %v1007_v20 = vpop.f32.mrf.mxu0 }
 0x187   : > { %v994_v22 = vpop.f32.mrf.mxu3 }
 0x188   : > { %v995_v23 = vadd.f32 %v1541_v21, %v994_v22  ;;  %v1022_v24 = vpop.f32.mrf.mxu1 }
 0x189   : > { %v1009_v25 = vpop.f32.mrf.mxu0 }
 0x18a   : > { %v1008_v26 = vadd.f32 %v1007_v20, %v995_v23 }
 0x18c   : > { %v1021_v27 = vadd.f32 %v1020_v38, %v1008_v26 }
 0x18e   : > { %v1024_v28 = vmax.f32 %v1021_v27, 0.0 }
 0x18f   : > { %v996_v29 = vpop.f32.mrf.mxu3 }
 0x190   : > { %1025 = vst [vmem:[%s364_s28] sm:$0xff] %v1024_v28 }
 0x191   : > { %1689 = shalt.err (!%p1686_p13)
}
 0x192   : > { %1462 = dma.vmem_to_hbm [thread:$0]  (%p1871_p2), %s1041_s17, 128, %s1043_s19, %s1027_s24  }
 0x193 PF: > { %s2022_s20 = sld [smem:[#allocation18_spill]]  ;;  %p1479_p0 = pnand %p1175_p6, %p1878_p5 }
 0x195   : > { %p1480_p4 = pneg %p1479_p0 }
 0x199   : > { %s1054_s30 = sand.u32 1, %s2022_s20  }
 0x19a   : > { %s1055_s27 = scalar_lea.sflag [#allocation6], %s1054_s30 }
 0x19b   : > { %1731 = dma.done.wait (%p1480_p4), %s1055_s27, 128  }
 0x19c   : > { %1733 = vsyncadd (%p1480_p4), %s1055_s27, 4294967168  ;;  %s26_s26 = sadd.s32 1, %s1756_s26   ;;  %s2024_s29 = sld [smem:[#allocation19_spill]] }
 0x19d   : > { %p23_p7 = scmp.ge.s32.totalorder %s26_s26, 4   ;;  %s2025_s23 = sld [smem:[#allocation22_spill]] }
 0x19e   : > { %s2026_s8 = sld [smem:[#allocation20_spill]]  ;;  %s2027_s21 = smov %s1740_s22 }
 0x19f   : > { %s2029_s24 = smov %s1752_s25 }
 0x1a0   :  { %25 = sbr.rel (!%p23_p7) target bundleno = 12 (0xc), region = 110 }
 0x1a2   : > { %s2028_s22 = smov %s2024_s29 }
 0x1a4   : > { %s2030_s25 = smov %s2026_s8 }
 0x1a5   :  { %1061 = vsyncpa [#allocation5], 1 }
 0x1a6   :  { %1063 = vsyncpa [#allocation5 + $0x1], 1 }
 0x1a7   :  { %1064 = vsyncpa [#allocation8], 1 }
 0x1a8   :  { %1066 = vsyncpa [#allocation8 + $0x1], 1 }
 0x1a9   :  { %1067 = vsyncpa [#allocation11], 1 }
 0x1aa   :  { %1068 = vsyncpa [#allocation6], 1 }
 0x1ab   :  { %1070 = vsyncpa [#allocation6 + $0x1], 1 }

</bundles_post_ra>
